<compile_context>
chip_gen: v7x
topology: tpu7x:2x2x1
jax: 0.10.0
libtpu: 0.0.40
codegen_flags: <defaults>
</compile_context>

<pallas_src>
import jax
import jax.numpy as jnp
from jax.experimental import pallas as pl
from jax.experimental.pallas import tpu as pltpu

HIDDEN = 256


def _round_up(x, m):
    return ((x + m - 1) // m) * m


def _qnet_kernel(z_ref, win_ref, wh_ref, vec_ref, out_ref):
    """One batch tile of the Q network; all weights stay VMEM-resident.

    z_ref   : [TB, ins+ctx]   bf16  rows = concat(state, action, context)
    win_ref : [ins+ctx, 3*H]  bf16  block-diag pack of [w0 | a0c | a1c]
    wh_ref  : [3, H, H]       bf16  stack of [a0h, w1, a1h]
    vec_ref : [8, H]          f32   rows: b0, ab0, b1, ab1, wo_row, bo_row, 0, 0
    out_ref : [TB, 1]         f32
    """
    H = vec_ref.shape[1]

    b0 = vec_ref[pl.ds(0, 1), :]            # [1, H]
    ab0 = vec_ref[pl.ds(1, 1), :]
    b1 = vec_ref[pl.ds(2, 1), :]
    ab1 = vec_ref[pl.ds(3, 1), :]
    wo = vec_ref[pl.ds(4, 1), :]
    bo = vec_ref[pl.ds(5, 1), :][:, :1]     # [1, 1]

    # Single MXU pass producing the layer-0 pre-activation AND both context
    # adapter contributions (block-diagonal packed weights, shared K axis).
    big = jnp.dot(z_ref[...], win_ref[...],
                  preferred_element_type=jnp.float32)       # [TB, 3H] f32
    h0_pre = big[:, :H]
    c0 = big[:, H:2 * H]                    # ctx @ a0c
    c1 = big[:, 2 * H:]                     # ctx @ a1c

    # ---- layer 0 (main) + residual ReLU adapter 0 ----
    h0 = jnp.maximum(h0_pre + b0, 0.0)
    ad0 = jnp.dot(h0.astype(jnp.bfloat16), wh_ref[0],
                  preferred_element_type=jnp.float32) + c0 + ab0
    h0 = h0 + jnp.maximum(ad0, 0.0)

    # ---- layer 1 (main) + residual ReLU adapter 1 ----
    h1 = jnp.dot(h0.astype(jnp.bfloat16), wh_ref[1],
                 preferred_element_type=jnp.float32) + b1
    h1 = jnp.maximum(h1, 0.0)
    ad1 = jnp.dot(h1.astype(jnp.bfloat16), wh_ref[2],
                  preferred_element_type=jnp.float32) + c1 + ab1
    h1 = h1 + jnp.maximum(ad1, 0.0)

    # ---- output head 256 -> 1 as VPU mul + XLU lane-reduce (no N=1 MXU pass)
    out_ref[...] = jnp.sum(h1 * wo, axis=-1, keepdims=True) + bo


def soft_q_forward(x, a, packed, context_dim, *, tile_b=512):
    """Split obs/context, concat action, pad batch, run the tiled kernel."""
    w_in, w_h, vec = packed
    H = vec.shape[1]

    ctx = x[:, -context_dim:]
    state = x[:, :-context_dim]
    z = jnp.concatenate([state, a, ctx], axis=1)            # [B, ins + ctx]
    B, F = z.shape

    # bf16 batch tiles need a sublane multiple of 16 unless the block spans
    # the whole (padded) batch.
    TB = tile_b if B >= tile_b else _round_up(max(B, 1), 16)
    B_pad = _round_up(B, TB)
    z = jnp.pad(z, ((0, B_pad - B), (0, 0))).astype(jnp.bfloat16)

    out = pl.pallas_call(
        _qnet_kernel,
        out_shape=jax.ShapeDtypeStruct((B_pad, 1), jnp.float32),
        grid_spec=pltpu.PrefetchScalarGridSpec(
            num_scalar_prefetch=0,
            grid=(B_pad // TB,),
            in_specs=[
                pl.BlockSpec((TB, F), lambda i: (i, 0)),        # batch tile
                pl.BlockSpec((F, 3 * H), lambda i: (0, 0)),     # resident weights
                pl.BlockSpec((3, H, H), lambda i: (0, 0, 0)),
                pl.BlockSpec((8, H), lambda i: (0, 0)),
            ],
            out_specs=pl.BlockSpec((TB, 1), lambda i: (i, 0)),
        ),
        compiler_params=pltpu.CompilerParams(
            dimension_semantics=("parallel",)),                 # megacore on v7x
    )(z, w_in, w_h, vec)
    return out[:B]


def init_params(key, ins, context_dim, hidden=HIDDEN):
    """Deterministic init mimicking torch.nn.Linear default (U[-1/sqrt(fan_in), +])."""
    def linear(k, fan_in, fan_out):
        kw, kb = jax.random.split(k)
        bound = 1.0 / jnp.sqrt(float(fan_in))
        w = jax.random.uniform(kw, (fan_in, fan_out), jnp.float32, -bound, bound)
        b = jax.random.uniform(kb, (1, fan_out), jnp.float32, -bound, bound)
        return w, b

    keys = jax.random.split(key, 5)
    w0, b0 = linear(keys[0], ins, hidden)
    w1, b1 = linear(keys[1], hidden, hidden)
    wo, bo = linear(keys[2], hidden, 1)
    # adapters take concat(hidden, context) -> hidden; store split weight blocks
    a0, ab0 = linear(keys[3], hidden + context_dim, hidden)
    a1, ab1 = linear(keys[4], hidden + context_dim, hidden)
    return {
        "w0": w0, "b0": b0,
        "a0h": a0[:hidden], "a0c": a0[hidden:], "ab0": ab0,
        "w1": w1, "b1": b1,
        "a1h": a1[:hidden], "a1c": a1[hidden:], "ab1": ab1,
        "wo": wo, "bo": bo,
    }


def pack_params(params, ins, context_dim, hidden=HIDDEN):
    """Consolidate 14 small tensors into 3 kernel operands (bf16 weights, f32 vecs)."""
    H = hidden
    F = ins + context_dim

    # Block-diagonal pack so one matmul with concat(state, a, ctx) yields
    # [x @ w0 | ctx @ a0c | ctx @ a1c].
    w_in = jnp.zeros((F, 3 * H), jnp.float32)
    w_in = w_in.at[:ins, :H].set(params["w0"])
    w_in = w_in.at[ins:, H:2 * H].set(params["a0c"])
    w_in = w_in.at[ins:, 2 * H:].set(params["a1c"])

    w_h = jnp.stack([params["a0h"], params["w1"], params["a1h"]], axis=0)

    vec = jnp.zeros((8, H), jnp.float32)
    vec = vec.at[0].set(params["b0"][0])
    vec = vec.at[1].set(params["ab0"][0])
    vec = vec.at[2].set(params["b1"][0])
    vec = vec.at[3].set(params["ab1"][0])
    vec = vec.at[4].set(params["wo"][:, 0])
    vec = vec.at[5].set(jnp.full((H,), params["bo"][0, 0]))

    return w_in.astype(jnp.bfloat16), w_h.astype(jnp.bfloat16), vec


def reference_forward(x, a, params, context_dim):
    """Pure-JAX reference with the same bf16-operand / f32-accumulate math."""
    bf = jnp.bfloat16
    ctx = x[:, -context_dim:]
    s = x[:, :-context_dim]
    z = jnp.concatenate([s, a], axis=1)

    def dot(u, w):
        return jnp.dot(u.astype(bf), w.astype(bf),
                       preferred_element_type=jnp.float32)

    h = jnp.maximum(dot(z, params["w0"]) + params["b0"], 0.0)
    ad = dot(h, params["a0h"]) + dot(ctx, params["a0c"]) + params["ab0"]
    h = h + jnp.maximum(ad, 0.0)
    h = jnp.maximum(dot(h, params["w1"]) + params["b1"], 0.0)
    ad = dot(h, params["a1h"]) + dot(ctx, params["a1c"]) + params["ab1"]
    h = h + jnp.maximum(ad, 0.0)
    return jnp.dot(h, params["wo"]) + params["bo"]


if __name__ == "__main__":
    # Small synthetic env dims (consistent with the module's constructor):
    #   observation = state (6) + context (3) -> obs_dim = 9, action dim = 2
    #   ins = obs_dim + act_dim - context_dim = 8
    B, state_dim, context_dim, act_dim = 2, 6, 3, 2
    obs_dim = state_dim + context_dim
    ins = obs_dim + act_dim - context_dim

    key = jax.random.PRNGKey(0)
    k_x, k_a, k_p, k_x2, k_a2 = jax.random.split(key, 5)
    params = init_params(k_p, ins, context_dim, HIDDEN)
    packed = pack_params(params, ins, context_dim, HIDDEN)

    # ---- tiny batch (single-tile path) ----
    x = jax.random.normal(k_x, (B, obs_dim), jnp.float32)
    a = jax.random.normal(k_a, (B, act_dim), jnp.float32)
    q = jax.block_until_ready(soft_q_forward(x, a, packed, context_dim))
    q_ref = reference_forward(x, a, params, context_dim)
    assert q.shape == (B, 1) and q.dtype == jnp.float32
    assert jnp.allclose(q, q_ref, rtol=5e-2, atol=5e-2)

    # ---- larger batch exercising the pipelined / megacore-parallel grid ----
    B2 = 1024
    x2 = jax.random.normal(k_x2, (B2, obs_dim), jnp.float32)
    a2 = jax.random.normal(k_a2, (B2, act_dim), jnp.float32)
    q2 = jax.block_until_ready(soft_q_forward(x2, a2, packed, context_dim))
    q2_ref = reference_forward(x2, a2, params, context_dim)
    assert q2.shape == (B2, 1)
    assert jnp.allclose(q2, q2_ref, rtol=5e-2, atol=5e-2)

    print("KERNEL_OK")
</pallas_src>

<mosaic_0001>
module attributes {stable_mosaic.version = 11 : i64} {
  func.func @_qnet_kernel(%arg0: i32, %arg1: memref<16x11xbf16, #tpu.memory_space<vmem>>, %arg2: memref<11x768xbf16, #tpu.memory_space<vmem>>, %arg3: memref<3x256x256xbf16, #tpu.memory_space<vmem>>, %arg4: memref<8x256xf32, #tpu.memory_space<vmem>>, %arg5: memref<16x1xf32, #tpu.memory_space<vmem>>) attributes {dimension_semantics = [#tpu.dimension_semantics<parallel>], iteration_bounds = array<i64: 1>, scalar_prefetch = 0 : i64, scratch_operands = 0 : i64, tpu.core_type = #tpu.core_type<tc>, window_params = [{transform_indices = @transform_0, window_bounds = array<i64: 16, 11>}, {pipeline_mode = #tpu.pipeline_mode<synchronous>, transform_indices = @transform_1, window_bounds = array<i64: 11, 768>}, {pipeline_mode = #tpu.pipeline_mode<synchronous>, transform_indices = @transform_2, window_bounds = array<i64: 3, 256, 256>}, {pipeline_mode = #tpu.pipeline_mode<synchronous>, transform_indices = @transform_3, window_bounds = array<i64: 8, 256>}, {transform_indices = @transform_4, window_bounds = array<i64: 16, 1>}]} {
    %c0 = arith.constant 0 : index
    %c0_0 = arith.constant 0 : index
    %0 = vector.load %arg4[%c0, %c0_0] : memref<8x256xf32, #tpu.memory_space<vmem>>, vector<1x256xf32>
    %c1 = arith.constant 1 : index
    %c0_1 = arith.constant 0 : index
    %1 = vector.load %arg4[%c1, %c0_1] : memref<8x256xf32, #tpu.memory_space<vmem>>, vector<1x256xf32>
    %c2 = arith.constant 2 : index
    %c0_2 = arith.constant 0 : index
    %2 = vector.load %arg4[%c2, %c0_2] : memref<8x256xf32, #tpu.memory_space<vmem>>, vector<1x256xf32>
    %c3 = arith.constant 3 : index
    %c0_3 = arith.constant 0 : index
    %3 = vector.load %arg4[%c3, %c0_3] : memref<8x256xf32, #tpu.memory_space<vmem>>, vector<1x256xf32>
    %c4 = arith.constant 4 : index
    %c0_4 = arith.constant 0 : index
    %4 = vector.load %arg4[%c4, %c0_4] : memref<8x256xf32, #tpu.memory_space<vmem>>, vector<1x256xf32>
    %c5 = arith.constant 5 : index
    %c0_5 = arith.constant 0 : index
    %5 = vector.load %arg4[%c5, %c0_5] : memref<8x256xf32, #tpu.memory_space<vmem>>, vector<1x256xf32>
    %6 = vector.extract_strided_slice %5 {offsets = [0, 0], sizes = [1, 1], strides = [1, 1]} : vector<1x256xf32> to vector<1x1xf32>
    %c0_6 = arith.constant 0 : index
    %c0_7 = arith.constant 0 : index
    %7 = vector.load %arg1[%c0_6, %c0_7] : memref<16x11xbf16, #tpu.memory_space<vmem>>, vector<16x11xbf16>
    %c0_8 = arith.constant 0 : index
    %c0_9 = arith.constant 0 : index
    %8 = vector.load %arg2[%c0_8, %c0_9] : memref<11x768xbf16, #tpu.memory_space<vmem>>, vector<11x768xbf16>
    %cst = arith.constant dense<0.000000e+00> : vector<16x768xf32>
    %9 = tpu.matmul %7, %8, %cst {dimension_numbers = #tpu.dot_dimension_numbers<[1], [0], [0], [1], [0, 0, 1, 1], [], []>} : vector<16x11xbf16>, vector<11x768xbf16>, vector<16x768xf32> -> vector<16x768xf32>
    %10 = vector.extract_strided_slice %9 {offsets = [0, 0], sizes = [16, 256], strides = [1, 1]} : vector<16x768xf32> to vector<16x256xf32>
    %11 = vector.extract_strided_slice %9 {offsets = [0, 256], sizes = [16, 256], strides = [1, 1]} : vector<16x768xf32> to vector<16x256xf32>
    %12 = vector.extract_strided_slice %9 {offsets = [0, 512], sizes = [16, 256], strides = [1, 1]} : vector<16x768xf32> to vector<16x256xf32>
    %13 = vector.broadcast %0 : vector<1x256xf32> to vector<16x256xf32>
    %14 = arith.addf %10, %13 : vector<16x256xf32>
    %cst_10 = arith.constant 0.000000e+00 : f32
    %15 = vector.broadcast %cst_10 : f32 to vector<16x256xf32>
    %16 = arith.maximumf %14, %15 : vector<16x256xf32>
    %17 = arith.truncf %16 : vector<16x256xf32> to vector<16x256xbf16>
    %c0_11 = arith.constant 0 : index
    %c0_12 = arith.constant 0 : index
    %c0_13 = arith.constant 0 : index
    %18 = vector.load %arg3[%c0_11, %c0_12, %c0_13] : memref<3x256x256xbf16, #tpu.memory_space<vmem>>, vector<1x256x256xbf16>
    %19 = vector.shape_cast %18 : vector<1x256x256xbf16> to vector<256x256xbf16>
    %cst_14 = arith.constant dense<0.000000e+00> : vector<16x256xf32>
    %20 = tpu.matmul %17, %19, %cst_14 {dimension_numbers = #tpu.dot_dimension_numbers<[1], [0], [0], [1], [0, 0, 1, 1], [], []>} : vector<16x256xbf16>, vector<256x256xbf16>, vector<16x256xf32> -> vector<16x256xf32>
    %21 = arith.addf %20, %11 : vector<16x256xf32>
    %22 = vector.broadcast %1 : vector<1x256xf32> to vector<16x256xf32>
    %23 = arith.addf %21, %22 : vector<16x256xf32>
    %cst_15 = arith.constant 0.000000e+00 : f32
    %24 = vector.broadcast %cst_15 : f32 to vector<16x256xf32>
    %25 = arith.maximumf %23, %24 : vector<16x256xf32>
    %26 = arith.addf %16, %25 : vector<16x256xf32>
    %27 = arith.truncf %26 : vector<16x256xf32> to vector<16x256xbf16>
    %c1_16 = arith.constant 1 : index
    %c0_17 = arith.constant 0 : index
    %c0_18 = arith.constant 0 : index
    %28 = vector.load %arg3[%c1_16, %c0_17, %c0_18] : memref<3x256x256xbf16, #tpu.memory_space<vmem>>, vector<1x256x256xbf16>
    %29 = vector.shape_cast %28 : vector<1x256x256xbf16> to vector<256x256xbf16>
    %cst_19 = arith.constant dense<0.000000e+00> : vector<16x256xf32>
    %30 = tpu.matmul %27, %29, %cst_19 {dimension_numbers = #tpu.dot_dimension_numbers<[1], [0], [0], [1], [0, 0, 1, 1], [], []>} : vector<16x256xbf16>, vector<256x256xbf16>, vector<16x256xf32> -> vector<16x256xf32>
    %31 = vector.broadcast %2 : vector<1x256xf32> to vector<16x256xf32>
    %32 = arith.addf %30, %31 : vector<16x256xf32>
    %cst_20 = arith.constant 0.000000e+00 : f32
    %33 = vector.broadcast %cst_20 : f32 to vector<16x256xf32>
    %34 = arith.maximumf %32, %33 : vector<16x256xf32>
    %35 = arith.truncf %34 : vector<16x256xf32> to vector<16x256xbf16>
    %c2_21 = arith.constant 2 : index
    %c0_22 = arith.constant 0 : index
    %c0_23 = arith.constant 0 : index
    %36 = vector.load %arg3[%c2_21, %c0_22, %c0_23] : memref<3x256x256xbf16, #tpu.memory_space<vmem>>, vector<1x256x256xbf16>
    %37 = vector.shape_cast %36 : vector<1x256x256xbf16> to vector<256x256xbf16>
    %cst_24 = arith.constant dense<0.000000e+00> : vector<16x256xf32>
    %38 = tpu.matmul %35, %37, %cst_24 {dimension_numbers = #tpu.dot_dimension_numbers<[1], [0], [0], [1], [0, 0, 1, 1], [], []>} : vector<16x256xbf16>, vector<256x256xbf16>, vector<16x256xf32> -> vector<16x256xf32>
    %39 = arith.addf %38, %12 : vector<16x256xf32>
    %40 = vector.broadcast %3 : vector<1x256xf32> to vector<16x256xf32>
    %41 = arith.addf %39, %40 : vector<16x256xf32>
    %cst_25 = arith.constant 0.000000e+00 : f32
    %42 = vector.broadcast %cst_25 : f32 to vector<16x256xf32>
    %43 = arith.maximumf %41, %42 : vector<16x256xf32>
    %44 = arith.addf %34, %43 : vector<16x256xf32>
    %45 = vector.broadcast %4 : vector<1x256xf32> to vector<16x256xf32>
    %46 = arith.mulf %44, %45 : vector<16x256xf32>
    %cst_26 = arith.constant dense<0.000000e+00> : vector<16xf32>
    %47 = vector.multi_reduction <add>, %46, %cst_26 [1] : vector<16x256xf32> to vector<16xf32>
    %48 = vector.shape_cast %47 : vector<16xf32> to vector<16x1xf32>
    %49 = vector.broadcast %6 : vector<1x1xf32> to vector<16x1xf32>
    %50 = arith.addf %48, %49 : vector<16x1xf32>
    %c0_27 = arith.constant 0 : index
    %c0_28 = arith.constant 0 : index
    %51 = vector.load %arg5[%c0_27, %c0_28] : memref<16x1xf32, #tpu.memory_space<vmem>>, vector<16x1xf32>
    tpu.vector_store %arg5[%c0_27, %c0_28], %50 {strides = array<i32>} : memref<16x1xf32, #tpu.memory_space<vmem>>, vector<16x1xf32>,
    return
  }
  func.func @transform_0(%arg0: i32) -> (i32, i32) {
    %c0_i32 = arith.constant 0 : i32
    %c0_i32_0 = arith.constant 0 : i32
    return %arg0, %c0_i32 : i32, i32
  }
  func.func @transform_1(%arg0: i32) -> (i32, i32) {
    %c0_i32 = arith.constant 0 : i32
    %c0_i32_0 = arith.constant 0 : i32
    %c0_i32_1 = arith.constant 0 : i32
    return %c0_i32, %c0_i32_0 : i32, i32
  }
  func.func @transform_2(%arg0: i32) -> (i32, i32, i32) {
    %c0_i32 = arith.constant 0 : i32
    %c0_i32_0 = arith.constant 0 : i32
    %c0_i32_1 = arith.constant 0 : i32
    %c0_i32_2 = arith.constant 0 : i32
    return %c0_i32, %c0_i32_0, %c0_i32_1 : i32, i32, i32
  }
  func.func @transform_3(%arg0: i32) -> (i32, i32) {
    %c0_i32 = arith.constant 0 : i32
    %c0_i32_0 = arith.constant 0 : i32
    %c0_i32_1 = arith.constant 0 : i32
    return %c0_i32, %c0_i32_0 : i32, i32
  }
  func.func @transform_4(%arg0: i32) -> (i32, i32) {
    %c0_i32 = arith.constant 0 : i32
    %c0_i32_0 = arith.constant 0 : i32
    return %arg0, %c0_i32 : i32, i32
  }
}

</mosaic_0001>

<bundles_post_ra>
// kernel: tpu_custom_call.1
= control target key start
LH: loop header
LB: loop body
LE: loop exit
PB: predicated region body
PF: predicated region fallthrough
CT: control target
= control target key end

     0   :  { %9 = vsyncpa [#allocation3], 0  ;;  %s1601_s0 = inlined_call_operand.hbm [shape: bf16[16,11], index: 0, kind: input, shape index: {}]   ;;  %s1602_s1 = inlined_call_operand.hbm [shape: bf16[11,768], index: 1, kind: input, shape index: {}]   ;;  %s1603_s2 = inlined_call_operand.hbm [shape: bf16[3,256,256], index: 2, kind: input, shape index: {}]   ;;  %s1604_s3 = inlined_call_operand.hbm [shape: f32[8,256], index: 3, kind: input, shape index: {}]   ;;  %s1605_s4 = inlined_call_operand.vmem [shape: f32[16,1], index: 4, kind: output, shape index: {}]  }
   0x1   :  { %10 = vsyncpa [#allocation5], 0 }
   0x2   :  { %11 = vsyncpa [#allocation8], 0  ;;  %s1480_s15 = smov [#allocation4]   ;;  %s1386_s19 = scalar_lea.hbm %s1602_s1, 768 }
   0x3   :  { %s29_s16 = sshll.u32 %s1480_s15, 4  ;;  %p1387_p0 = scmp.ne.s32.totalorder %s1602_s1, %s1386_s19  ;;  %s30_s16 = int_to_ptr.vmem [resolvable:$true] %s29_s16 }
   0x4   :  { %p1390_p1 = scmp.lt.u32.totalorder %s1386_s19, %s1602_s1 }
   0x6   :  { %p1392_p2 = pnand %p1390_p1, %p1387_p0 }
   0x8   :  { %1395 = shalt.err (!%p1392_p2)
}
   0x9   :  { %s1396_s24 = scalar_lea.vmem %s30_s16, 768  ;;  %p1401_p4 = scmp.lt.s32.totalorder %s30_s16, %s30_s16 }
   0xa   :  { %p1397_p3 = scmp.ne.s32.totalorder %s30_s16, %s1396_s24  ;;  %p1402_p5 = scmp.lt.s32.totalorder %s1396_s24, %s1396_s24 }
   0xc   :  { %p1403_p6 = por %p1402_p5, %p1401_p4 }
   0xe   :  { %p1404_p7 = pnand %p1403_p6, %p1397_p3 }
  0x10   :  { %1407 = shalt.err (!%p1404_p7)
}
  0x11   :  { %s1481_s25 = smov 384   ;;  %s1482_s26 = smov 24  }
  0x12   :  { %35 = dma.hbm_to_vmem [thread:$0]  %s1602_s1, 768, %s30_s16, [#allocation5], %s1481_s25, %s1481_s25, %s1482_s26  }
  0x13   :  { %s1483_s29 = smov [#allocation2]   ;;  %s1408_s7 = scalar_lea.hbm %s1601_s0, 128 }
  0x14   :  { %s17_s30 = sshll.u32 %s1483_s29, 4  ;;  %p1409_p8 = scmp.ne.s32.totalorder %s1601_s0, %s1408_s7  ;;  %s18_s30 = int_to_ptr.vmem [resolvable:$true] %s17_s30 }
  0x15   :  { %p1412_p9 = scmp.lt.u32.totalorder %s1408_s7, %s1601_s0 }
  0x17   :  { %p1414_p10 = pnand %p1412_p9, %p1409_p8 }
  0x19   :  { %1417 = shalt.err (!%p1414_p10)
}
  0x1a   :  { %s1418_s12 = scalar_lea.vmem %s18_s30, 128  ;;  %p1423_p12 = scmp.lt.s32.totalorder %s18_s30, %s18_s30 }
  0x1b   :  { %p1419_p11 = scmp.ne.s32.totalorder %s18_s30, %s1418_s12  ;;  %p1424_p13 = scmp.lt.s32.totalorder %s1418_s12, %s1418_s12 }
  0x1d   :  { %p1425_p0 = por %p1424_p13, %p1423_p12 }
  0x1f   :  { %p1426_p1 = pnand %p1425_p0, %p1419_p11 }
  0x21   :  { %1429 = shalt.err (!%p1426_p1)
}
  0x22   :  { %s1484_s1 = smov 64   ;;  %s1485_s13 = smov 4  }
  0x23   :  { %23 = dma.hbm_to_vmem [thread:$0]  %s1601_s0, 128, %s18_s30, [#allocation3], %s1484_s1, %s1484_s1, %s1485_s13  }
  0x24   :  { %s1486_s16 = smov [#allocation6]   ;;  %s1430_s20 = scalar_lea.hbm %s1603_s2, 12288 }
  0x25   :  { %s41_s17 = sshll.u32 %s1486_s16, 4  ;;  %p1431_p2 = scmp.ne.s32.totalorder %s1603_s2, %s1430_s20  ;;  %s42_s17 = int_to_ptr.vmem [resolvable:$true] %s41_s17 }
  0x26   :  { %p1434_p3 = scmp.lt.u32.totalorder %s1430_s20, %s1603_s2 }
  0x28   :  { %p1436_p4 = pnand %p1434_p3, %p1431_p2 }
  0x2a   :  { %1439 = shalt.err (!%p1436_p4)
}
  0x2b   :  { %s1440_s25 = scalar_lea.vmem %s42_s17, 12288  ;;  %p1445_p6 = scmp.lt.s32.totalorder %s42_s17, %s42_s17 }
  0x2c   :  { %p1441_p5 = scmp.ne.s32.totalorder %s42_s17, %s1440_s25  ;;  %p1446_p7 = scmp.lt.s32.totalorder %s1440_s25, %s1440_s25 }
  0x2e   :  { %p1447_p8 = por %p1446_p7, %p1445_p6 }
  0x30   :  { %p1448_p9 = pnand %p1447_p8, %p1441_p5 }
  0x32   :  { %1451 = shalt.err (!%p1448_p9)
}
  0x33   :  { %s1487_s0 = smov 128   ;;  %s1488_s26 = smov 8  }
  0x34   :  { %47 = dma.hbm_to_vmem [thread:$0]  %s1603_s2, 12288, %s42_s17, [#allocation5], %s1487_s0, %s1487_s0, %s1488_s26  }
  0x35   :  { %s1489_s29 = smov [#allocation7]   ;;  %s1452_s7 = scalar_lea.hbm %s1604_s3, 256 }
  0x36   :  { %s54_s30 = sshll.u32 %s1489_s29, 4  ;;  %p1453_p10 = scmp.ne.s32.totalorder %s1604_s3, %s1452_s7  ;;  %s55_s30 = int_to_ptr.vmem [resolvable:$true] %s54_s30 }
  0x37   :  { %p1456_p11 = scmp.lt.u32.totalorder %s1452_s7, %s1604_s3 }
  0x39   :  { %p1458_p12 = pnand %p1456_p11, %p1453_p10 }
  0x3b   :  { %1461 = shalt.err (!%p1458_p12)
}
  0x3c   :  { %s1462_s12 = scalar_lea.vmem %s55_s30, 256  ;;  %p1467_p0 = scmp.lt.s32.totalorder %s55_s30, %s55_s30 }
  0x3d   :  { %p1463_p13 = scmp.ne.s32.totalorder %s55_s30, %s1462_s12  ;;  %p1468_p1 = scmp.lt.s32.totalorder %s1462_s12, %s1462_s12 }
  0x3f   :  { %p1469_p2 = por %p1468_p1, %p1467_p0 }
  0x41   :  { %p1470_p3 = pnand %p1469_p2, %p1463_p13 }
  0x43   :  { %1473 = shalt.err (!%p1470_p3)
}
  0x44   :  { %57 = dma.hbm_to_vmem [thread:$0]  %s1604_s3, 256, %s55_s30, [#allocation8]  }
  0x45   :  { %1474 = dma.done.wait [#allocation3], 128  }
  0x46   :  { %1475 = vsyncadd [#allocation3], 4294967168 }
  0x47   :  { %1476 = dma.done.wait [#allocation5], 13056  }
  0x48   :  { %1477 = vsyncadd [#allocation5], 4294954240 }
  0x49   :  { %1478 = dma.done.wait [#allocation8], 256  }
  0x4a   :  { %1479 = vsyncadd [#allocation8], 4294967040  ;;  %vm123_vm0 = vcmask 1044480   ;;  %v1490_v0 = vmov 0   ;;  %vm124_vm1 = vcmask 1045504   ;;  %v1491_v1 = vmov 65535  }
  0x4b   :  { %177 = vmatprep.mubr.bf16.mxu1 %v1490_v0  ;;  %v125_v2 = vsel %vm123_vm0, 4294967295, %v1491_v1  ;;  %v1232_v4 = vld [vmem:[#allocation4 + $0x4] ss:$24 sps:$4 sm:$0x3f]   ;;  %vm119_vm2 = vcmask 89088   ;;  %vm1096_vm3 = vcmask 7168  }
  0x4c   :  { %v126_v3 = vsel %vm124_vm1, %v125_v2, 0  ;;  %v1234_v5 = vld [vmem:[#allocation4] ss:$24 sps:$4 sm:$0x3f]   ;;  %v1244_v17 = vld [vmem:[#allocation6 + $0x4] ss:$8 sps:$4 sm:$0xff]  }
  0x4d   :  { %v131_v6 = vand.u32 %v1232_v4, %v126_v3  ;;  %v128_v7 = vand.u32 %v1234_v5, %v126_v3  ;;  %v1236_v8 = vld [vmem:[#allocation4 + $0x8] ss:$24 sps:$4 sm:$0x3f]   ;;  %v1238_v9 = vld [vmem:[#allocation4 + $0xc] ss:$24 sps:$4 sm:$0x3f]  }
  0x4e   :  { %v1235_v10 = vld [vmem:[#allocation2] sm:$0xff]   ;;  %v137_v11 = vand.u32 %v1238_v9, %v126_v3  ;;  %v134_v12 = vand.u32 %v1236_v8, %v126_v3  ;;  %v1241_v13 = vld [vmem:[#allocation4 + $0x14] ss:$24 sps:$4 sm:$0x3f]   ;;  %v1245_v20 = vld [vmem:[#allocation6 + $0x10] ss:$8 sps:$4 sm:$0xff]  }
  0x4f   :  { %145 = vmatprep.subr.bf16.mxu1 %v131_v6  ;;  %v143_v14 = vand.u32 %v1241_v13, %v126_v3  ;;  %v1239_v15 = vld [vmem:[#allocation4 + $0x10] ss:$24 sps:$4 sm:$0x3f]   ;;  %v1247_v19 = vld [vmem:[#allocation6 + $0x14] ss:$8 sps:$4 sm:$0xff]  }
  0x50   :  { %146 = vmatpush1.bf16.msra.mxu1 %v128_v7  ;;  %v140_v16 = vand.u32 %v1239_v15, %v126_v3  ;;  %v1242_v18 = vld [vmem:[#allocation6] ss:$8 sps:$4 sm:$0xff]   ;;  %v1250_v21 = vld [vmem:[#allocation6 + $0x24] ss:$8 sps:$4 sm:$0xff]   ;;  %v1253_v23 = vld [vmem:[#allocation6 + $0x34] ss:$8 sps:$4 sm:$0xff]  }
  0x51   :  { %188 = vmatprep.subr.bf16.mxu1 %v137_v11  ;;  %v1248_v22 = vld [vmem:[#allocation6 + $0x20] ss:$8 sps:$4 sm:$0xff]   ;;  %v1251_v24 = vld [vmem:[#allocation6 + $0x30] ss:$8 sps:$4 sm:$0xff]   ;;  %v1256_v25 = vld [vmem:[#allocation6 + $0x44] ss:$8 sps:$4 sm:$0xff]   ;;  %v275_v11 = vlaneseq }
  0x52   :  { %v1254_v26 = vld [vmem:[#allocation6 + $0x40] ss:$8 sps:$4 sm:$0xff]   ;;  %v1259_v27 = vld [vmem:[#allocation6 + $0x54] ss:$8 sps:$4 sm:$0xff]   ;;  %v1257_v28 = vld [vmem:[#allocation6 + $0x50] ss:$8 sps:$4 sm:$0xff]  }
  0x53   :  { %1113 = vmatmul.mubr.msk.bf16.vlgmr.msra.gmra.mrb[0].mxu1 %vm119_vm2, %v1235_v10  ;;  %v1262_v29 = vld [vmem:[#allocation6 + $0x64] ss:$8 sps:$4 sm:$0xff]   ;;  %v1260_v30 = vld [vmem:[#allocation6 + $0x60] ss:$8 sps:$4 sm:$0xff]   ;;  %v1265_v31 = vld [vmem:[#allocation6 + $0x74] ss:$8 sps:$4 sm:$0xff]  }
  0x54   :  { %189 = vmatpush1.bf16.msra.mxu1 %v134_v12  ;;  %220 = vmatprep.mubr.bf16.mxu1 %v1490_v0  ;;  %v1263_v32 = vld [vmem:[#allocation6 + $0x70] ss:$8 sps:$4 sm:$0xff]   ;;  %v1268_v33 = vld [vmem:[#allocation6 + $0x84] ss:$8 sps:$4 sm:$0xff]   ;;  %v1266_v34 = vld [vmem:[#allocation6 + $0x80] ss:$8 sps:$4 sm:$0xff]  }
  0x55   :  { %231 = vmatprep.subr.bf16.mxu1 %v143_v14  ;;  %v1271_v35 = vld [vmem:[#allocation6 + $0x94] ss:$8 sps:$4 sm:$0xff]   ;;  %v1269_v36 = vld [vmem:[#allocation6 + $0x90] ss:$8 sps:$4 sm:$0xff]   ;;  %v1274_v37 = vld [vmem:[#allocation6 + $0xa4] ss:$8 sps:$4 sm:$0xff]  }
  0x56   :  { %v1272_v38 = vld [vmem:[#allocation6 + $0xa0] ss:$8 sps:$4 sm:$0xff]   ;;  %v1277_v39 = vld [vmem:[#allocation6 + $0xb4] ss:$8 sps:$4 sm:$0xff]   ;;  %v1275_v40 = vld [vmem:[#allocation6 + $0xb0] ss:$8 sps:$4 sm:$0xff]  }
  0x57   :  { %v1280_v41 = vld [vmem:[#allocation6 + $0xc4] ss:$8 sps:$4 sm:$0xff]   ;;  %v1278_v42 = vld [vmem:[#allocation6 + $0xc0] ss:$8 sps:$4 sm:$0xff]   ;;  %v1283_v43 = vld [vmem:[#allocation6 + $0xd4] ss:$8 sps:$4 sm:$0xff]  }
  0x58   :  { %v1281_v44 = vld [vmem:[#allocation6 + $0xd0] ss:$8 sps:$4 sm:$0xff]   ;;  %v1286_v45 = vld [vmem:[#allocation6 + $0xe4] ss:$8 sps:$4 sm:$0xff]   ;;  %v1284_v46 = vld [vmem:[#allocation6 + $0xe0] ss:$8 sps:$4 sm:$0xff]  }
  0x59   :  { %v1289_v47 = vld [vmem:[#allocation6 + $0xf4] ss:$8 sps:$4 sm:$0xff]   ;;  %v1287_v48 = vld [vmem:[#allocation6 + $0xf0] ss:$8 sps:$4 sm:$0xff]   ;;  %v1290_v49 = vld [vmem:[#allocation6 + $0x104] ss:$8 sps:$4 sm:$0xff]  }
  0x5a   :  { %v1292_v50 = vld [vmem:[#allocation6 + $0x100] ss:$8 sps:$4 sm:$0xff]   ;;  %v1293_v51 = vld [vmem:[#allocation6 + $0x114] ss:$8 sps:$4 sm:$0xff]   ;;  %759 = vmatprep.subr.bf16.mxu0 %v1290_v49  ;;  %v1295_v52 = vld [vmem:[#allocation6 + $0x110] ss:$8 sps:$4 sm:$0xff]  }
  0x5b   :  { %1114 = vmatmul.mubr.msk.bf16.vlgmr.msra.gmra.mrb[4].mxu1 %vm119_vm2, %v1235_v10  ;;  %760 = vmatpush1.bf16.msra.mxu0 %v1292_v50  ;;  %v1296_v53 = vld [vmem:[#allocation6 + $0x124] ss:$8 sps:$4 sm:$0xff]   ;;  %v1298_v54 = vld [vmem:[#allocation6 + $0x120] ss:$8 sps:$4 sm:$0xff]   ;;  %v1299_v55 = vld [vmem:[#allocation6 + $0x134] ss:$8 sps:$4 sm:$0xff]  }
  0x5c   :  { %232 = vmatpush1.bf16.msra.mxu1 %v140_v16  ;;  %263 = vmatprep.mubr.bf16.mxu1 %v1490_v0  ;;  %v1301_v56 = vld [vmem:[#allocation6 + $0x130] ss:$8 sps:$4 sm:$0xff]   ;;  %v1302_v57 = vld [vmem:[#allocation6 + $0x144] ss:$8 sps:$4 sm:$0xff]   ;;  %v1304_v58 = vld [vmem:[#allocation6 + $0x140] ss:$8 sps:$4 sm:$0xff]  }
  0x5d   :  { %487 = vmatprep.subr.bf16.mxu1 %v1244_v17  ;;  %761 = vmatprep.subr.bf16.mxu0 %v1293_v51  ;;  %v1305_v59 = vld [vmem:[#allocation6 + $0x154] ss:$8 sps:$4 sm:$0xff]   ;;  %v1307_v60 = vld [vmem:[#allocation6 + $0x150] ss:$8 sps:$4 sm:$0xff]   ;;  %v1308_v61 = vld [vmem:[#allocation6 + $0x164] ss:$8 sps:$4 sm:$0xff]  }
  0x5e   :  { %v1310_v62 = vld [vmem:[#allocation6 + $0x160] ss:$8 sps:$4 sm:$0xff]   ;;  %v1311_v63 = vld [vmem:[#allocation6 + $0x174] ss:$8 sps:$4 sm:$0xff]   ;;  %v1313_v0 = vld [vmem:[#allocation6 + $0x170] ss:$8 sps:$4 sm:$0xff]  }
  0x5f   :  { %762 = vmatpush1.bf16.msra.mxu0 %v1295_v52  ;;  %v1314_v1 = vld [vmem:[#allocation6 + $0x184] ss:$8 sps:$4 sm:$0xff]   ;;  %v1316_v2 = vld [vmem:[#allocation6 + $0x180] ss:$8 sps:$4 sm:$0xff]   ;;  %v1317_v3 = vld [vmem:[#allocation6 + $0x194] ss:$8 sps:$4 sm:$0xff]  }
  0x60   :  { %763 = vmatprep.subr.bf16.mxu0 %v1296_v53  ;;  %v1319_v4 = vld [vmem:[#allocation6 + $0x190] ss:$8 sps:$4 sm:$0xff]   ;;  %v1320_v5 = vld [vmem:[#allocation6 + $0x1a4] ss:$8 sps:$4 sm:$0xff]   ;;  %v1322_v6 = vld [vmem:[#allocation6 + $0x1a0] ss:$8 sps:$4 sm:$0xff]  }
  0x61   :  { %v1323_v7 = vld [vmem:[#allocation6 + $0x1b4] ss:$8 sps:$4 sm:$0xff]   ;;  %v1325_v8 = vld [vmem:[#allocation6 + $0x1b0] ss:$8 sps:$4 sm:$0xff]   ;;  %v1326_v9 = vld [vmem:[#allocation6 + $0x1c4] ss:$8 sps:$4 sm:$0xff]  }
  0x62   :  { %v276_v12 = vshrl.u32 %v275_v11, 7  ;;  %v71_v14 = vld [vmem:[#allocation7] ss:$8 sm:$0x3]  ;;  %v1358_v11 = vld [vmem:[#allocation6 + $0x264] ss:$8 sps:$4 sm:$0xff]  }
  0x63   :  { %1115 = vmatmul.mubr.msk.bf16.vlgmr.msra.gmra.mrb[8].mxu1 %vm119_vm2, %v1235_v10  ;;  %764 = vmatpush1.bf16.msra.mxu0 %v1298_v54  ;;  %v1328_v10 = vld [vmem:[#allocation6 + $0x1c0] ss:$8 sps:$4 sm:$0xff]  }
  0x64   :  { %488 = vmatpush1.bf16.msra.mxu1 %v1242_v18  ;;  %765 = vmatprep.subr.bf16.mxu0 %v1299_v55  ;;  %v1568_v13 = vsub.s32 1, %v276_v12  ;;  %v1570_v15 = vsub.s32 0, %v276_v12  ;;  %v1356_v12 = vld [vmem:[#allocation6 + $0x260] ss:$8 sps:$4 sm:$0xff]  }
  0x65   :  { %489 = vmatprep.subr.bf16.mxu1 %v1247_v19 }
  0x66   :  { %v282_v16 = vrot.slane %v71_v14, %v1568_v13  ;;  %v278_v17 = vrot.slane %v71_v14, %v1570_v15  ;;  %v1361_v14 = vld [vmem:[#allocation6 + $0x274] ss:$8 sps:$4 sm:$0xff]  }
  0x67   :  { %766 = vmatpush1.bf16.msra.mxu0 %v1301_v56 }
  0x68   :  { %490 = vmatpush1.bf16.msra.mxu1 %v1245_v20  ;;  %767 = vmatprep.subr.bf16.mxu0 %v1302_v57 }
  0x69   :  { %491 = vmatprep.subr.bf16.mxu1 %v1250_v21 }
  0x6b   :  { %768 = vmatpush1.bf16.msra.mxu0 %v1304_v58 }
  0x6c   :  { %492 = vmatpush1.bf16.msra.mxu1 %v1248_v22  ;;  %769 = vmatprep.subr.bf16.mxu0 %v1305_v59 }
  0x6d   :  { %493 = vmatprep.subr.bf16.mxu1 %v1253_v23 }
  0x6f   :  { %770 = vmatpush1.bf16.msra.mxu0 %v1307_v60 }
  0x70   :  { %494 = vmatpush1.bf16.msra.mxu1 %v1251_v24  ;;  %771 = vmatprep.subr.bf16.mxu0 %v1308_v61 }
  0x71   :  { %495 = vmatprep.subr.bf16.mxu1 %v1256_v25 }
  0x73   :  { %772 = vmatpush1.bf16.msra.mxu0 %v1310_v62 }
  0x74   :  { %496 = vmatpush1.bf16.msra.mxu1 %v1254_v26  ;;  %773 = vmatprep.subr.bf16.mxu0 %v1311_v63 }
  0x75   :  { %497 = vmatprep.subr.bf16.mxu1 %v1259_v27 }
  0x77   :  { %774 = vmatpush1.bf16.msra.mxu0 %v1313_v0  ;;  %v1338_v0 = vld [vmem:[#allocation6 + $0x200] ss:$8 sps:$4 sm:$0xff]  }
  0x78   :  { %498 = vmatpush1.bf16.msra.mxu1 %v1257_v28  ;;  %775 = vmatprep.subr.bf16.mxu0 %v1314_v1  ;;  %v1343_v1 = vld [vmem:[#allocation6 + $0x214] ss:$8 sps:$4 sm:$0xff]  }
  0x79   :  { %499 = vmatprep.subr.bf16.mxu1 %v1262_v29 }
  0x7b   :  { %776 = vmatpush1.bf16.msra.mxu0 %v1316_v2  ;;  %v1341_v2 = vld [vmem:[#allocation6 + $0x210] ss:$8 sps:$4 sm:$0xff]  }
  0x7c   :  { %500 = vmatpush1.bf16.msra.mxu1 %v1260_v30  ;;  %777 = vmatprep.subr.bf16.mxu0 %v1317_v3  ;;  %v1346_v3 = vld [vmem:[#allocation6 + $0x224] ss:$8 sps:$4 sm:$0xff]  }
  0x7d   :  { %501 = vmatprep.subr.bf16.mxu1 %v1265_v31 }
  0x7f   :  { %778 = vmatpush1.bf16.msra.mxu0 %v1319_v4  ;;  %v1344_v4 = vld [vmem:[#allocation6 + $0x220] ss:$8 sps:$4 sm:$0xff]  }
  0x80   :  { %502 = vmatpush1.bf16.msra.mxu1 %v1263_v32  ;;  %779 = vmatprep.subr.bf16.mxu0 %v1320_v5  ;;  %v1349_v5 = vld [vmem:[#allocation6 + $0x234] ss:$8 sps:$4 sm:$0xff]  }
  0x81   :  { %503 = vmatprep.subr.bf16.mxu1 %v1268_v33 }
  0x83   :  { %780 = vmatpush1.bf16.msra.mxu0 %v1322_v6  ;;  %v1347_v6 = vld [vmem:[#allocation6 + $0x230] ss:$8 sps:$4 sm:$0xff]  }
  0x84   :  { %504 = vmatpush1.bf16.msra.mxu1 %v1266_v34  ;;  %781 = vmatprep.subr.bf16.mxu0 %v1323_v7  ;;  %v1352_v7 = vld [vmem:[#allocation6 + $0x244] ss:$8 sps:$4 sm:$0xff]  }
  0x85   :  { %505 = vmatprep.subr.bf16.mxu1 %v1271_v35 }
  0x87   :  { %782 = vmatpush1.bf16.msra.mxu0 %v1325_v8  ;;  %v1350_v8 = vld [vmem:[#allocation6 + $0x240] ss:$8 sps:$4 sm:$0xff]  }
  0x88   :  { %506 = vmatpush1.bf16.msra.mxu1 %v1269_v36  ;;  %783 = vmatprep.subr.bf16.mxu0 %v1326_v9  ;;  %v1329_v36 = vld [vmem:[#allocation6 + $0x1d4] ss:$8 sps:$4 sm:$0xff]  }
  0x89   :  { %507 = vmatprep.subr.bf16.mxu1 %v1274_v37  ;;  %v1331_v37 = vld [vmem:[#allocation6 + $0x1d0] ss:$8 sps:$4 sm:$0xff]   ;;  %v1355_v9 = vld [vmem:[#allocation6 + $0x254] ss:$8 sps:$4 sm:$0xff]  }
  0x8b   :  { %784 = vmatpush1.bf16.msra.mxu0 %v1328_v10  ;;  %v1353_v10 = vld [vmem:[#allocation6 + $0x250] ss:$8 sps:$4 sm:$0xff]  }
  0x8c   :  { %508 = vmatpush1.bf16.msra.mxu1 %v1272_v38  ;;  %785 = vmatprep.subr.bf16.mxu0 %v1329_v36  ;;  %v1332_v38 = vld [vmem:[#allocation6 + $0x1e4] ss:$8 sps:$4 sm:$0xff]   ;;  %v1383_v36 = vld [vmem:[#allocation6 + $0x2f0] ss:$8 sps:$4 sm:$0xff]  }
  0x8d   :  { %509 = vmatprep.subr.bf16.mxu1 %v1277_v39  ;;  %v1334_v39 = vld [vmem:[#allocation6 + $0x1e0] ss:$8 sps:$4 sm:$0xff]  }
  0x8f   :  { %786 = vmatpush1.bf16.msra.mxu0 %v1331_v37  ;;  %v75_v37 = vld [vmem:[#allocation7 + $0x2] ss:$8 sm:$0x3] }
  0x90   :  { %510 = vmatpush1.bf16.msra.mxu1 %v1275_v40  ;;  %787 = vmatprep.subr.bf16.mxu0 %v1332_v38  ;;  %v1335_v40 = vld [vmem:[#allocation6 + $0x1f4] ss:$8 sps:$4 sm:$0xff]   ;;  %v596_v38 = vrot.slane %v75_v37, %v1568_v13 }
  0x91   :  { %511 = vmatprep.subr.bf16.mxu1 %v1280_v41  ;;  %v1337_v41 = vld [vmem:[#allocation6 + $0x1f0] ss:$8 sps:$4 sm:$0xff]  }
  0x93   :  { %788 = vmatpush1.bf16.msra.mxu0 %v1334_v39  ;;  %v592_v39 = vrot.slane %v75_v37, %v1570_v15 }
  0x94   :  { %512 = vmatpush1.bf16.msra.mxu1 %v1278_v42  ;;  %789 = vmatprep.subr.bf16.mxu0 %v1335_v40  ;;  %v1340_v42 = vld [vmem:[#allocation6 + $0x204] ss:$8 sps:$4 sm:$0xff]  }
  0x95   :  { %513 = vmatprep.subr.bf16.mxu1 %v1283_v43  ;;  %v73_v43 = vld [vmem:[#allocation7 + $0x1] ss:$8 sm:$0x3] }
  0x97   :  { %790 = vmatpush1.bf16.msra.mxu0 %v1337_v41 }
  0x98   :  { %514 = vmatpush1.bf16.msra.mxu1 %v1281_v44  ;;  %1001 = vmatprep.subr.bf16.mxu0 %v1340_v42  ;;  %v534_v44 = vrot.slane %v73_v43, %v1570_v15 }
  0x99   :  { %515 = vmatprep.subr.bf16.mxu1 %v1286_v45  ;;  %v538_v45 = vrot.slane %v73_v43, %v1568_v13 }
  0x9c   :  { %516 = vmatpush1.bf16.msra.mxu1 %v1284_v46 }
  0x9d   :  { %517 = vmatprep.subr.bf16.mxu1 %v1289_v47 }
  0xa0   :  { %518 = vmatpush1.bf16.msra.mxu1 %v1287_v48 }
 0x126   :  { %v179_v18 = vpop.f32.mrb[0].mxu1 }
 0x127   :  { %v181_v19 = vpop.f32.mrb[1].mxu1  ;;  %v285_v22 = vadd.f32 %v278_v17, %v179_v18  ;;  %v1362_v18 = vld [vmem:[#allocation6 + $0x280] ss:$8 sps:$4 sm:$0xff]  }
 0x128   :  { %v286_v20 = vadd.f32 %v282_v16, %v181_v19  ;;  %v183_v21 = vpop.f32.mrb[2].mxu1  ;;  %v1367_v19 = vld [vmem:[#allocation6 + $0x294] ss:$8 sps:$4 sm:$0xff]  }
 0x129   :  { %v287_v23 = vadd.f32 %v278_v17, %v183_v21  ;;  %v185_v24 = vpop.f32.mrb[3].mxu1  ;;  %v289_v29 = vmax.f32 %v285_v22, 0.0  ;;  %v1364_v17 = vld [vmem:[#allocation6 + $0x284] ss:$8 sps:$4 sm:$0xff]   ;;  %v1368_v22 = vld [vmem:[#allocation6 + $0x2a0] ss:$8 sps:$4 sm:$0xff]  }
 0x12a   :  { %v288_v25 = vadd.f32 %v282_v16, %v185_v24  ;;  %v290_v27 = vmax.f32 %v286_v20, 0.0  ;;  %v1359_v16 = vld [vmem:[#allocation6 + $0x270] ss:$8 sps:$4 sm:$0xff]   ;;  %v1370_v21 = vld [vmem:[#allocation6 + $0x2a4] ss:$8 sps:$4 sm:$0xff]  }
 0x12b   :  { %v291_v26 = vmax.f32 %v287_v23, 0.0  ;;  %v1365_v20 = vld [vmem:[#allocation6 + $0x290] ss:$8 sps:$4 sm:$0xff]   ;;  %v1373_v23 = vld [vmem:[#allocation6 + $0x2b4] ss:$8 sps:$4 sm:$0xff]  }
 0x12c   :  { %v292_v28 = vmax.f32 %v288_v25, 0.0  ;;  %v1371_v24 = vld [vmem:[#allocation6 + $0x2b0] ss:$8 sps:$4 sm:$0xff]   ;;  %v1376_v25 = vld [vmem:[#allocation6 + $0x2c4] ss:$8 sps:$4 sm:$0xff]  }
 0x12d   :  { %v293_v31 = vpack.c.bf16 %v291_v26, %v289_v29 }
 0x12e   :  { %v294_v30 = vpack.c.bf16 %v292_v28, %v290_v27 }
 0x130   :  { %519 = vmatprep.mubr.bf16.mxu1 %v294_v30  ;;  %v1380_v30 = vld [vmem:[#allocation6 + $0x2e0] ss:$8 sps:$4 sm:$0xff]  }
 0x131   :  { %520 = vmatmul.mubr.bf16.vlgmr.msra.gmra.mrb[4].mxu1 %v293_v31  ;;  %v1385_v31 = vld [vmem:[#allocation6 + $0x2f4] ss:$8 sps:$4 sm:$0xff]  }
 0x136   :  { %v1574_v32 = vpop.f32.mrb[8].mxu1 }
 0x137   :  { %v1576_v33 = vpop.f32.mrb[9].mxu1 }
 0x138   :  { %v1578_v34 = vpop.f32.mrb[10].mxu1 }
 0x139   :  { %v1580_v35 = vpop.f32.mrb[11].mxu1 }
 0x204   :  { %v521_v46 = vpop.f32.mrb[4].mxu1 }
 0x205   :  { %v541_v47 = vadd.f32 %v534_v44, %v521_v46  ;;  %v523_v48 = vpop.f32.mrb[5].mxu1 }
 0x206   :  { %v542_v49 = vadd.f32 %v538_v45, %v523_v48  ;;  %v525_v50 = vpop.f32.mrb[6].mxu1 }
 0x207   :  { %v545_v51 = vmax.f32 %v541_v47, 0.0  ;;  %v543_v52 = vadd.f32 %v534_v44, %v525_v50  ;;  %v527_v53 = vpop.f32.mrb[7].mxu1 }
 0x208   :  { %v546_v54 = vmax.f32 %v542_v49, 0.0  ;;  %v544_v55 = vadd.f32 %v538_v45, %v527_v53 }
 0x209   :  { %v547_v56 = vmax.f32 %v543_v52, 0.0  ;;  %v549_v58 = vadd.f32 %v545_v51, %v289_v29  ;;  %v1382_v29 = vld [vmem:[#allocation6 + $0x2e4] ss:$8 sps:$4 sm:$0xff]  }
 0x20a   :  { %v548_v57 = vmax.f32 %v544_v55, 0.0  ;;  %v550_v60 = vadd.f32 %v546_v54, %v290_v27  ;;  %v1379_v27 = vld [vmem:[#allocation6 + $0x2d4] ss:$8 sps:$4 sm:$0xff]   ;;  %v77_v54 = vld [vmem:[#allocation7 + $0x3] ss:$8 sm:$0x3] }
 0x20b   :  { %v551_v59 = vadd.f32 %v547_v56, %v291_v26  ;;  %v1374_v26 = vld [vmem:[#allocation6 + $0x2c0] ss:$8 sps:$4 sm:$0xff]   ;;  %v1048_v55 = vrot.slane %v77_v54, %v1570_v15 }
 0x20c   :  { %v552_v61 = vadd.f32 %v548_v57, %v292_v28  ;;  %v1377_v28 = vld [vmem:[#allocation6 + $0x2d0] ss:$8 sps:$4 sm:$0xff]   ;;  %v1052_v57 = vrot.slane %v77_v54, %v1568_v13 }
 0x20d   :  { %v553_v62 = vpack.c.bf16 %v551_v59, %v549_v58 }
 0x20e   :  { %v554_v63 = vpack.c.bf16 %v552_v61, %v550_v60 }
 0x210   :  { %791 = vmatprep.mubr.bf16.mxu0 %v554_v63 }
 0x211   :  { %792 = vmatmul.mubr.bf16.vlgmr.msra.gmra.mrb[0].mxu0 %v553_v62  ;;  %v79_v62 = vld [vmem:[#allocation7 + $0x4] ss:$8 sm:$0x3] }
 0x212   :  { %1002 = vmatpush1.bf16.msra.mxu0 %v1338_v0 }
 0x213   :  { %1003 = vmatprep.subr.bf16.mxu0 %v1343_v1 }
 0x216   :  { %1004 = vmatpush1.bf16.msra.mxu0 %v1341_v2 }
 0x217   :  { %1005 = vmatprep.subr.bf16.mxu0 %v1346_v3 }
 0x21a   :  { %1006 = vmatpush1.bf16.msra.mxu0 %v1344_v4 }
 0x21b   :  { %1007 = vmatprep.subr.bf16.mxu0 %v1349_v5 }
 0x21e   :  { %1008 = vmatpush1.bf16.msra.mxu0 %v1347_v6  ;;  %v1071_v6 = vrot.slane %v79_v62, %v1570_v15 }
 0x21f   :  { %1009 = vmatprep.subr.bf16.mxu0 %v1352_v7 }
 0x222   :  { %1010 = vmatpush1.bf16.msra.mxu0 %v1350_v8 }
 0x223   :  { %1011 = vmatprep.subr.bf16.mxu0 %v1355_v9 }
 0x226   :  { %1012 = vmatpush1.bf16.msra.mxu0 %v1353_v10 }
 0x227   :  { %1013 = vmatprep.subr.bf16.mxu0 %v1358_v11 }
 0x22a   :  { %1014 = vmatpush1.bf16.msra.mxu0 %v1356_v12 }
 0x22b   :  { %1015 = vmatprep.subr.bf16.mxu0 %v1361_v14 }
 0x22e   :  { %1016 = vmatpush1.bf16.msra.mxu0 %v1359_v16 }
 0x22f   :  { %1017 = vmatprep.subr.bf16.mxu0 %v1364_v17 }
 0x232   :  { %1018 = vmatpush1.bf16.msra.mxu0 %v1362_v18 }
 0x233   :  { %1019 = vmatprep.subr.bf16.mxu0 %v1367_v19 }
 0x236   :  { %1020 = vmatpush1.bf16.msra.mxu0 %v1365_v20  ;;  %v81_v20 = vld [vmem:[#allocation7 + $0x5] ss:$8 sm:$0x3] }
 0x237   :  { %1021 = vmatprep.subr.bf16.mxu0 %v1370_v21  ;;  %v1092_v21 = vrot.slane %v81_v20, %v1570_v15 }
 0x23a   :  { %1022 = vmatpush1.bf16.msra.mxu0 %v1368_v22 }
 0x23b   :  { %1023 = vmatprep.subr.bf16.mxu0 %v1373_v23 }
 0x23e   :  { %1024 = vmatpush1.bf16.msra.mxu0 %v1371_v24 }
 0x23f   :  { %1025 = vmatprep.subr.bf16.mxu0 %v1376_v25 }
 0x242   :  { %1026 = vmatpush1.bf16.msra.mxu0 %v1374_v26 }
 0x243   :  { %1027 = vmatprep.subr.bf16.mxu0 %v1379_v27 }
 0x246   :  { %1028 = vmatpush1.bf16.msra.mxu0 %v1377_v28 }
 0x247   :  { %1029 = vmatprep.subr.bf16.mxu0 %v1382_v29 }
 0x24a   :  { %1030 = vmatpush1.bf16.msra.mxu0 %v1380_v30 }
 0x24b   :  { %1031 = vmatprep.subr.bf16.mxu0 %v1385_v31 }
 0x24e   :  { %1032 = vmatpush1.bf16.msra.mxu0 %v1383_v36 }
 0x2e4   :  { %v793_v40 = vpop.f32.mrb[0].mxu0 }
 0x2e5   :  { %v795_v41 = vpop.f32.mrb[1].mxu0  ;;  %v794_v44 = vadd.f32 %v793_v40, %v592_v39 }
 0x2e6   :  { %v796_v42 = vadd.f32 %v795_v41, %v596_v38  ;;  %v797_v43 = vpop.f32.mrb[2].mxu0 }
 0x2e7   :  { %v798_v45 = vadd.f32 %v797_v43, %v592_v39  ;;  %v799_v46 = vpop.f32.mrb[3].mxu0  ;;  %v802_v51 = vmax.f32 %v794_v44, 0.0 }
 0x2e8   :  { %v800_v47 = vadd.f32 %v799_v46, %v596_v38  ;;  %v803_v49 = vmax.f32 %v796_v42, 0.0 }
 0x2e9   :  { %v804_v48 = vmax.f32 %v798_v45, 0.0 }
 0x2ea   :  { %v805_v50 = vmax.f32 %v800_v47, 0.0 }
 0x2eb   :  { %v806_v53 = vpack.c.bf16 %v804_v48, %v802_v51 }
 0x2ec   :  { %v807_v52 = vpack.c.bf16 %v805_v50, %v803_v49 }
 0x2ee   :  { %1033 = vmatprep.mubr.bf16.mxu0 %v807_v52 }
 0x2ef   :  { %1034 = vmatmul.mubr.bf16.vlgmr.msra.gmra.mrb[4].mxu0 %v806_v53 }
 0x3c2   :  { %v1035_v56 = vpop.f32.mrb[4].mxu0 }
 0x3c3   :  { %v1036_v58 = vadd.f32 %v1035_v56, %v1574_v32  ;;  %v1037_v59 = vpop.f32.mrb[5].mxu0  ;;  %v1075_v32 = vrot.slane %v79_v62, %v1568_v13 }
 0x3c4   :  { %v1038_v60 = vadd.f32 %v1037_v59, %v1576_v33  ;;  %v1039_v61 = vpop.f32.mrb[6].mxu0 }
 0x3c5   :  { %v1055_v63 = vadd.f32 %v1048_v55, %v1036_v58  ;;  %v1040_v0 = vadd.f32 %v1039_v61, %v1578_v34  ;;  %v1041_v1 = vpop.f32.mrb[7].mxu0 }
 0x3c6   :  { %v1056_v2 = vadd.f32 %v1052_v57, %v1038_v60  ;;  %v1042_v3 = vadd.f32 %v1041_v1, %v1580_v35 }
 0x3c7   :  { %v1059_v4 = vmax.f32 %v1055_v63, 0.0  ;;  %v1057_v5 = vadd.f32 %v1048_v55, %v1040_v0 }
 0x3c8   :  { %v1060_v7 = vmax.f32 %v1056_v2, 0.0  ;;  %v1058_v8 = vadd.f32 %v1052_v57, %v1042_v3 }
 0x3c9   :  { %v1061_v9 = vmax.f32 %v1057_v5, 0.0  ;;  %v1063_v10 = vadd.f32 %v1059_v4, %v802_v51 }
 0x3ca   :  { %v1062_v33 = vmax.f32 %v1058_v8, 0.0  ;;  %v1064_v11 = vadd.f32 %v1060_v7, %v803_v49 }
 0x3cb   :  { %v1065_v12 = vadd.f32 %v1061_v9, %v804_v48  ;;  %v1078_v14 = vmul.f32 %v1071_v6, %v1063_v10 }
 0x3cc   :  { %v1066_v16 = vadd.f32 %v1062_v33, %v805_v50  ;;  %v1079_v34 = vmul.f32 %v1075_v32, %v1064_v11 }
 0x3cd   :  { %v1080_v17 = vmul.f32 %v1071_v6, %v1065_v12 }
 0x3ce   :  { %v1082_v18 = vadd.f32 %v1079_v34, %v1078_v14  ;;  %v1081_v19 = vmul.f32 %v1075_v32, %v1066_v16 }
 0x3d0   :  { %1083 = vadd.xlane.f32.xlu0 %v1082_v18  ;;  %v1085_v35 = vadd.f32 %v1081_v19, %v1080_v17 }
 0x3d4   :  { %1086 = vadd.xlane.f32.xlu0 %v1085_v35 }
 0x45d   :  { %v1084_v22 = vpop.xlane.xlu0 %1083 }
 0x45e   :  { %v1094_v13 = vadd.f32 %v1092_v21, %v1084_v22 }
 0x460   :  { %1097 = vst.msk [vmem:[%s1605_s4] sm:$0xff] %vm1096_vm3, %v1094_v13 }
 0x461   :  { %v1087_v23 = vpop.xlane.xlu0 %1086 }
 0x462   :  { %v1095_v24 = vadd.f32 %v1092_v21, %v1087_v23 }
 0x464   :  { %1098 = vst.msk [vmem:[%s1605_s4 + $0x8] sm:$0xff] %vm1096_vm3, %v1095_v24 }
 0x465   :  { %1103 = vsyncpa [#allocation3], 1 }
 0x466   :  { %1104 = vsyncpa [#allocation5], 1 }
 0x467   :  { %1105 = vsyncpa [#allocation8], 1 }

</bundles_post_ra>
